<compile_context>
chip_gen: v7x
topology: tpu7x:2x2x1
jax: 0.10.0
libtpu: 0.0.40
codegen_flags: <defaults>
</compile_context>

<pallas_src>
import math

import jax
import jax.numpy as jnp
from jax.experimental import pallas as pl
from jax.experimental.pallas import tpu as pltpu


def _shared_dropout_kernel(x_ref, m_ref, o_ref):
    # Pure element-wise broadcast multiply (VPU only). The mask block
    # broadcasts along the shared (second-minor) axis in the 3-D path and
    # along lanes in the 2-D path.
    o_ref[...] = x_ref[...] * m_ref[...]


def _make_shared_mask(key, x_shape, dtype, shared_dim, keep_prob):
    """Dropout mask of x_shape with shared_dim -> 1, pre-scaled by 1/keep_prob.

    Deliberate choice: the mask is pre-scaled in x.dtype (bakes 1/keep_prob
    rounding into the mask for low-precision dtypes); matches the reference
    below.
    """
    mask_shape = list(x_shape)
    mask_shape[shared_dim] = 1
    keep = jax.random.bernoulli(key, keep_prob, shape=tuple(mask_shape))
    return jnp.where(
        keep,
        jnp.asarray(1.0 / keep_prob, dtype),
        jnp.asarray(0.0, dtype),
    )


def _vmem_limit_bytes():
    """Generation-aware scoped-VMEM budget for this kernel."""
    phys = 128 * 1024 * 1024
    try:
        info = pltpu.get_tpu_info()
        phys = int(getattr(info, "vmem_capacity_bytes", phys))
    except Exception:
        pass
    if phys <= 64 * 1024 * 1024:      # v7x-class: 64 MiB per TensorCore
        return 48 * 1024 * 1024
    return 64 * 1024 * 1024           # v5e / v6e: 128 MiB physical


def _round_down(v, m):
    return (v // m) * m


def shared_dropout(x, key, p, shared_dim=1):
    """SharedDropout forward (training mode)."""
    p = float(p)
    shared_dim = shared_dim % x.ndim
    if p <= 0.0:
        return x                      # no-op: skip the HBM round-trip entirely
    keep_prob = 1.0 - p
    if keep_prob <= 0.0:
        return jnp.zeros_like(x)

    mask = _make_shared_mask(key, x.shape, x.dtype, shared_dim, keep_prob)

    shape = x.shape
    Bp = max(1, int(math.prod(shape[:shared_dim])))
    S = int(shape[shared_dim])
    M = max(1, int(math.prod(shape[shared_dim + 1:])))

    itemsize = jnp.dtype(x.dtype).itemsize
    sub = max(8, 32 // itemsize)      # sublane multiple: f32=8, bf16=16, int8=32
    vmem_limit = _vmem_limit_bytes()
    # in + out blocks are double-buffered (4x tile) + mask + headroom -> ~1/8.
    target = vmem_limit // 8

    if M == 1:
        # shared_dim is the last axis: canonical 2-D layout (B', S) with a
        # (B', 1) mask broadcast along the (lane-dense) last dim.
        x2 = x.reshape(Bp, S)
        m2 = mask.reshape(Bp, 1)

        if S > 128:
            tS = min(S, max(128, _round_down(target // (sub * itemsize), 128)))
            if tS >= S:
                tS = S
        else:
            tS = S
        row_bytes = max(1, tS * itemsize)
        cap = max(1, target // row_bytes)
        if cap >= Bp:
            tB = Bp
        else:
            tB = min(Bp, max(sub, _round_down(cap, sub)))
        # Keep >= 2 grid steps so v7x's two TensorCores both get work.
        if pl.cdiv(Bp, tB) * pl.cdiv(S, tS) < 2 and Bp > sub and tB > sub:
            half = (tB + 1) // 2
            tB = max(sub, _round_down(half + sub - 1, sub))

        grid = (pl.cdiv(Bp, tB), pl.cdiv(S, tS))
        out2 = pl.pallas_call(
            _shared_dropout_kernel,
            out_shape=jax.ShapeDtypeStruct((Bp, S), x.dtype),
            grid=grid,
            in_specs=[
                pl.BlockSpec((tB, tS), lambda b, s: (b, s)),   # x tile
                pl.BlockSpec((tB, 1), lambda b, s: (b, 0)),    # shared mask
            ],
            out_specs=pl.BlockSpec((tB, tS), lambda b, s: (b, s)),
            compiler_params=pltpu.CompilerParams(
                dimension_semantics=("parallel", "parallel"),
                vmem_limit_bytes=vmem_limit,
            ),
        )(x2, m2)
        return out2.reshape(shape)

    # General canonical 3-D layout (B', S, M): lane-dense last dim when M is a
    # multiple of 128.
    # TODO(synk): when M is lane-sparse (< 128 or not a multiple of 128), fold
    # adjacent non-shared dims / transpose so stores are wide and unmasked.
    x3 = x.reshape(Bp, S, M)
    m3 = mask.reshape(Bp, 1, M)

    # --- choose tM (last dim): tile only when a min-height block overflows ---
    if M > 128:
        min_rows = max(1, min(S, sub))
        if min_rows * M * itemsize > target:
            tM = min(M, max(128, _round_down(target // (min_rows * itemsize), 128)))
        else:
            tM = M
    else:
        tM = M                         # full extent (always legal)

    # --- choose tS (shared axis), rounded to the dtype sublane multiple ---
    row_bytes = max(1, tM * itemsize)
    cap = max(1, target // row_bytes)
    if cap >= S or S <= sub:
        tS = S
    else:
        tS = min(S, max(sub, _round_down(cap, sub)))

    # --- choose tB: fold small-S AlphaFold shapes into multi-MiB steps ---
    if tS == S and tM == M:
        per_b = max(1, S * M * itemsize)
        tB = max(1, min(Bp, target // per_b))
    else:
        tB = 1
    # Keep >= 2 grid steps so v7x's two TensorCores both get work.
    if pl.cdiv(Bp, tB) * pl.cdiv(M, tM) * pl.cdiv(S, tS) < 2 and tB > 1:
        tB = max(1, (tB + 1) // 2)

    # Grid order (b, m, s) with s innermost: the mask block index (b, 0, m) is
    # constant across consecutive steps, so its DMA is skipped (mask reuse).
    grid = (pl.cdiv(Bp, tB), pl.cdiv(M, tM), pl.cdiv(S, tS))

    out3 = pl.pallas_call(
        _shared_dropout_kernel,
        out_shape=jax.ShapeDtypeStruct((Bp, S, M), x.dtype),
        grid=grid,
        in_specs=[
            pl.BlockSpec((tB, tS, tM), lambda b, m, s: (b, s, m)),   # x tile
            pl.BlockSpec((tB, 1, tM), lambda b, m, s: (b, 0, m)),    # shared mask
        ],
        out_specs=pl.BlockSpec((tB, tS, tM), lambda b, m, s: (b, s, m)),
        compiler_params=pltpu.CompilerParams(
            dimension_semantics=("parallel", "parallel", "parallel"),
            vmem_limit_bytes=vmem_limit,
        ),
    )(x3, m3)
    return out3.reshape(shape)


if __name__ == "__main__":
    key = jax.random.PRNGKey(0)
    x_key, mask_key, mask_key2 = jax.random.split(key, 3)

    B, S, R, C = 2, 4, 8, 128           # small AlphaFold-like activation block
    p = 0.25
    keep_prob = 1.0 - p

    x = jax.random.normal(x_key, (B, S, R, C), dtype=jnp.float32)

    # Case 1: shared_dim = 1 (common AlphaFold row/column-shared dropout).
    out = shared_dropout(x, mask_key, p, shared_dim=1)
    out = jax.block_until_ready(out)
    mask = _make_shared_mask(mask_key, x.shape, x.dtype, 1, keep_prob)
    expected = x * mask
    assert out.shape == x.shape and out.dtype == x.dtype
    assert bool(jnp.allclose(out, expected, atol=1e-6, rtol=1e-6)), \
        "kernel output mismatch vs reference (shared_dim=1)"

    # Case 2: shared_dim = last axis (exercises the 2-D lane-broadcast path).
    out2 = shared_dropout(x, mask_key2, p, shared_dim=3)
    out2 = jax.block_until_ready(out2)
    mask2 = _make_shared_mask(mask_key2, x.shape, x.dtype, 3, keep_prob)
    expected2 = x * mask2
    assert out2.shape == x.shape and out2.dtype == x.dtype
    assert bool(jnp.allclose(out2, expected2, atol=1e-6, rtol=1e-6)), \
        "kernel output mismatch vs reference (shared_dim=last)"

    print("KERNEL_OK")
</pallas_src>

<mosaic_0001>
module attributes {stable_mosaic.version = 11 : i64} {
  func.func @_shared_dropout_kernel(%arg0: i32, %arg1: i32, %arg2: i32, %arg3: memref<1x4x1024xf32, #tpu.memory_space<vmem>>, %arg4: memref<1x1x1024xf32, #tpu.memory_space<vmem>>, %arg5: memref<1x4x1024xf32, #tpu.memory_space<vmem>>) attributes {dimension_semantics = [#tpu.dimension_semantics<parallel>, #tpu.dimension_semantics<parallel>, #tpu.dimension_semantics<parallel>], iteration_bounds = array<i64: 2, 1, 1>, scalar_prefetch = 0 : i64, scratch_operands = 0 : i64, tpu.core_type = #tpu.core_type<tc>, window_params = [{transform_indices = @transform_0, window_bounds = array<i64: 1, 4, 1024>}, {transform_indices = @transform_1, window_bounds = array<i64: 1, 1, 1024>}, {transform_indices = @transform_2, window_bounds = array<i64: 1, 4, 1024>}]} {
    %c0 = arith.constant 0 : index
    %c0_0 = arith.constant 0 : index
    %c0_1 = arith.constant 0 : index
    %0 = vector.load %arg3[%c0, %c0_0, %c0_1] : memref<1x4x1024xf32, #tpu.memory_space<vmem>>, vector<1x4x1024xf32>
    %c0_2 = arith.constant 0 : index
    %c0_3 = arith.constant 0 : index
    %c0_4 = arith.constant 0 : index
    %1 = vector.load %arg4[%c0_2, %c0_3, %c0_4] : memref<1x1x1024xf32, #tpu.memory_space<vmem>>, vector<1x1x1024xf32>
    %2 = vector.broadcast %1 : vector<1x1x1024xf32> to vector<1x4x1024xf32>
    %3 = arith.mulf %0, %2 : vector<1x4x1024xf32>
    %c0_5 = arith.constant 0 : index
    %c0_6 = arith.constant 0 : index
    %c0_7 = arith.constant 0 : index
    %4 = vector.load %arg5[%c0_5, %c0_6, %c0_7] : memref<1x4x1024xf32, #tpu.memory_space<vmem>>, vector<1x4x1024xf32>
    tpu.vector_store %arg5[%c0_5, %c0_6, %c0_7], %3 {strides = array<i32>} : memref<1x4x1024xf32, #tpu.memory_space<vmem>>, vector<1x4x1024xf32>,
    return
  }
  func.func @transform_0(%arg0: i32, %arg1: i32, %arg2: i32) -> (i32, i32, i32) {
    %c0_i32 = arith.constant 0 : i32
    return %arg0, %arg2, %arg1 : i32, i32, i32
  }
  func.func @transform_1(%arg0: i32, %arg1: i32, %arg2: i32) -> (i32, i32, i32) {
    %c0_i32 = arith.constant 0 : i32
    %c0_i32_0 = arith.constant 0 : i32
    return %arg0, %c0_i32, %arg1 : i32, i32, i32
  }
  func.func @transform_2(%arg0: i32, %arg1: i32, %arg2: i32) -> (i32, i32, i32) {
    %c0_i32 = arith.constant 0 : i32
    return %arg0, %arg2, %arg1 : i32, i32, i32
  }
}

</mosaic_0001>

<bundles_post_ra>
// kernel: tpu_custom_call.1
= control target key start
LH: loop header
LB: loop body
LE: loop exit
PB: predicated region body
PF: predicated region fallthrough
CT: control target
= control target key end

     0   :  { %7 = vsyncpa [#allocation3], 0  ;;  %s906_s0 = inlined_call_operand.hbm [shape: f32[2,4,1024], index: 0, kind: input, shape index: {}]   ;;  %s907_s1 = inlined_call_operand.hbm [shape: f32[2,1,1024], index: 1, kind: input, shape index: {}]   ;;  %s908_s2 = inlined_call_operand.hbm [shape: f32[2,4,1024], index: 2, kind: output, shape index: {}]  }
   0x1   :  { %9 = vsyncpa [#allocation3 + $0x1], 0 }
   0x2   :  { %10 = vsyncpa [#allocation6], 0 }
   0x3   :  { %12 = vsyncpa [#allocation6 + $0x1], 0 }
   0x4   :  { %13 = vsyncpa [#allocation4], 0 }
   0x5   :  { %15 = vsyncpa [#allocation4 + $0x1], 0  ;;  %s681_s9 = smov 0   ;;  %s683_s10 = smov 0  }
   0x6   :  { %s685_s11 = smov 0   ;;  %s687_s12 = smov 0  }
   0x7   :  { %s689_s13 = smov 0   ;;  %s691_s14 = smov 0  }
   0x8 LB: > { %s426_s15 = sadd.s32 4294967295, %s661_s14   ;;  %s427_s16 = sadd.s32 4294967294, %s661_s14   ;;  %s661_s14 = sphi %s691_s14, %s21_s14   ;;  %s657_s13 = sphi %s689_s13, %s928_s13   ;;  %s653_s12 = sphi %s687_s12, %s927_s12   ;;  %s649_s11 = sphi %s685_s11, %s926_s11   ;;  %s645_s10 = sphi %s683_s10, %s925_s10   ;;  %s641_s9 = sphi %s681_s9, %s924_s9  }
   0x9   : > { %s40_s17 = sadd.s32 1, %s657_s13  ;;  %s51_s18 = sadd.s32 1, %s649_s11 }
   0xa   : > { %p42_p0 = scmp.ge.s32.totalorder %s40_s17, 2  ;;  %p58_p1 = scmp.ne.s32.totalorder %s649_s11, %s645_s10 }
   0xb   : > { %p59_p2 = scmp.eq.s32.totalorder %s661_s14, 0  ;;  %p64_p3 = scmp.ne.s32.totalorder %s645_s10, %s641_s9 }
   0xc   : > { %s930_s17 = smov (%p42_p0, %s40_s17), 0  ;;  %p65_p5 = scmp.eq.s32.totalorder %s426_s15, 0 }
   0xd   : > { %p722_p4 = por %p59_p2, %p58_p1  ;;  %s44_s20 = ssub.s32 %s657_s13, %s930_s17 }
   0xe   : > { %p120_p6 = scmp.eq.s32.totalorder %s426_s15, 1  ;;  %p49_p7 = scmp.eq.s32.totalorder %s44_s20, 0 }
   0xf   : > { %p728_p8 = por %p65_p5, %p64_p3  ;;  %p126_p10 = scmp.eq.s32.totalorder %s427_s16, 1 }
  0x10   : > { %p732_p9 = por %p120_p6, %p58_p1  ;;  %p465_p13 = scmp.lt.s32.totalorder %s661_s14, 2 }
  0x11   : > { %s912_s21 = scalar_select %p728_p8, 1, 0 }
  0x12   : > { %s913_s22 = scalar_select %p732_p9, 1, 0 }
  0x13   : > { %s737_s23 = scalar_select %p49_p7, %s649_s11, %s51_s18  }
  0x14   : > { %p739_p11 = por %p126_p10, %p64_p3  ;;  %s746_s25 = sand.u32 1, %s649_s11  }
  0x15   : > { %s430_s26 = sshll.u32 %s746_s25, 5  ;;  %s445_s27 = sshll.u32 %s657_s13, 9 }
  0x16   : > { %s914_s24 = scalar_select %p739_p11, 1, 0 }
  0x17   : > { %s753_s30 = scalar_lea.hbm %s906_s0, %s445_s27  ;;  %s150_s3 = scalar_lea.vmem [#allocation2], %s430_s26 }
  0x18   : > { %s162_s4 = sshll.u32 %s150_s3, 4  ;;  %p759_p0 = pnand %p465_p13, %p722_p4  ;;  %s755_s4 = int_to_ptr.vmem [resolvable:$true] %s162_s4 }
  0x19   : > { %s147_s6 = scalar_lea.sflag [#allocation3], %s746_s25  ;;  %s515_s7 = scalar_lea.hbm %s753_s30, 512 }
  0x1a   : > { %p516_p3 = scmp.ne.s32.totalorder %s753_s30, %s515_s7  ;;  %p517_p5 = pneg %p759_p0 }
  0x1b   : > { %s520_s16 = scalar_lea.hbm %s906_s0, 1024  ;;  %p521_p4 = scmp.lt.u32.totalorder %s753_s30, %s906_s0 }
  0x1c   : > { %p518_p6 = pnand %p517_p5, %p516_p3  ;;  %p522_p10 = scmp.lt.u32.totalorder %s520_s16, %s515_s7 }
  0x1d   : > { %p524_p12 = scmp.lt.u32.totalorder %s515_s7, %s753_s30 }
  0x1e   : > { %p519_p7 = pneg %p518_p6  ;;  %p523_p13 = por %p522_p10, %p521_p4 }
  0x20   : > { %p525_p1 = por %p524_p12, %p523_p13 }
  0x22   : > { %p526_p2 = pnand %p525_p1, %p519_p7 }
  0x24   : > { %529 = shalt.err (!%p526_p2)
}
  0x25   : > { %s530_s20 = scalar_lea.vmem %s755_s4, 512  ;;  %s663_s26 = smov [#allocation2]  }
  0x26   : > { %p531_p3 = scmp.ne.s32.totalorder %s755_s4, %s530_s20  ;;  %s535_s27 = sshll.u32 %s663_s26, 4  ;;  %s536_s27 = int_to_ptr.vmem [resolvable:$false] %s535_s27 }
  0x27   : > { %s537_s28 = scalar_lea.vmem %s536_s27, 1024  ;;  %p538_p9 = scmp.lt.s32.totalorder %s755_s4, %s536_s27 }
  0x28   : > { %p533_p6 = pnand %p531_p3, %p517_p5  ;;  %p539_p4 = scmp.lt.s32.totalorder %s537_s28, %s530_s20 }
  0x2a   : > { %p534_p11 = pneg %p533_p6  ;;  %p540_p10 = por %p539_p4, %p538_p9 }
  0x2c   : > { %p541_p12 = pnand %p540_p10, %p534_p11 }
  0x2e   : > { %544 = shalt.err (!%p541_p12)
}
  0x2f   : > { %457 = dma.hbm_to_vmem [thread:$0]  (!%p759_p0), %s753_s30, 512, %s755_s4, %s147_s6  }
  0x30   : > { %p916_p1 = scmp.lt.s32.totalorder %s661_s14, 3  ;;  %p917_p2 = scmp.ge.s32.totalorder %s661_s14, 1 }
  0x31   : > { %s433_s3 = sshll.u32 %s746_s25, 3  ;;  %s446_s7 = sshll.u32 %s657_s13, 7 }
  0x32   : > { %p795_p7 = pnand %p917_p2, %p916_p1  ;;  %s804_s16 = scalar_lea.hbm %s907_s1, %s446_s7 }
  0x33   : > { %s173_s18 = scalar_lea.vmem [#allocation5], %s433_s3  ;;  %s170_s30 = scalar_lea.sflag [#allocation6], %s746_s25 }
  0x34   : > { %s918_s29 = scalar_select %p795_p7, 1, 0 }
  0x35   : > { %s183_s19 = sshll.u32 %s173_s18, 4  ;;  %s545_s4 = scalar_lea.hbm %s804_s16, 128  ;;  %s184_s19 = int_to_ptr.vmem [resolvable:$true] %s183_s19 }
  0x36   : > { %p546_p9 = scmp.ne.s32.totalorder %s804_s16, %s545_s4  ;;  %s550_s26 = scalar_lea.hbm %s907_s1, 256 }
  0x37   : > { %p551_p3 = scmp.lt.u32.totalorder %s804_s16, %s907_s1  ;;  %p552_p6 = scmp.lt.u32.totalorder %s550_s26, %s545_s4 }
  0x38   : > { %p548_p11 = pnand %p546_p9, %p517_p5  ;;  %p554_p10 = scmp.lt.u32.totalorder %s545_s4, %s804_s16 }
  0x39   : > { %p553_p4 = por %p552_p6, %p551_p3 }
  0x3a   : > { %p549_p13 = pneg %p548_p11 }
  0x3b   : > { %p555_p12 = por %p554_p10, %p553_p4 }
  0x3d   : > { %p556_p1 = pnand %p555_p12, %p549_p13 }
  0x3f   : > { %559 = shalt.err (!%p556_p1)
}
  0x40   : > { %s560_s25 = scalar_lea.vmem %s184_s19, 128  ;;  %s664_s3 = smov [#allocation5]  }
  0x41   : > { %p561_p2 = scmp.ne.s32.totalorder %s184_s19, %s560_s25  ;;  %s565_s7 = sshll.u32 %s664_s3, 4  ;;  %s566_s7 = int_to_ptr.vmem [resolvable:$false] %s565_s7 }
  0x42   : > { %s567_s8 = scalar_lea.vmem %s566_s7, 256  ;;  %p568_p8 = scmp.lt.s32.totalorder %s184_s19, %s566_s7 }
  0x43   : > { %p563_p9 = pnand %p561_p2, %p517_p5  ;;  %p569_p7 = scmp.lt.s32.totalorder %s567_s8, %s560_s25 }
  0x45   : > { %p564_p11 = pneg %p563_p9  ;;  %p570_p3 = por %p569_p7, %p568_p8 }
  0x47   : > { %p571_p6 = pnand %p570_p3, %p564_p11 }
  0x49   : > { %574 = shalt.err (!%p571_p6)
}
  0x4a   : > { %460 = dma.hbm_to_vmem [thread:$0]  (!%p759_p0), %s804_s16, 128, %s184_s19, %s170_s30  }
  0x4b   : > { %p919_p13 = scmp.ne.s32.totalorder %s918_s29, 0 }
  0x4c   : > { %s829_s15 = sand.u32 (!%p919_p13), 1, %s645_s10   ;;  %p920_p8 = scmp.ne.s32.totalorder (!%p919_p13), %s912_s21, 0 }
  0x4d   : > { %192 = sbr.rel (%p919_p13) target bundleno = 115 (0x73), region = 28  ;;  %s437_s18 = sshll.u32 (!%p919_p13), %s829_s15, 5 }
  0x4e   : > { %s195_s4 = scalar_lea.sflag (!%p919_p13), [#allocation3], %s829_s15  ;;  %s835_s6 = scalar_lea.vmem (!%p919_p13), [#allocation2], %s437_s18 }
  0x54   : > { %628 = dma.done.wait (%p920_p8), %s195_s4, 512  }
  0x55   : > { %630 = vsyncadd (%p920_p8), %s195_s4, 4294966784  ;;  %s438_s5 = sshll.u32 %s829_s15, 3  ;;  %s204_s29 = scalar_lea.sflag [#allocation6], %s829_s15 }
  0x56   : > { %s207_s16 = scalar_lea.vmem [#allocation5], %s438_s5 }
  0x57   : > { %632 = dma.done.wait (%p920_p8), %s204_s29, 128  }
  0x58   : > { %634 = vsyncadd (%p920_p8), %s204_s29, 4294967168  ;;  %v242_v0 = vlaneseq  ;;  %v240_v10 = vld [vmem:[%s207_s16] sm:$0xff]  ;;  %s232_s21 = scalar_lea.vmem [#allocation7], %s437_s18  ;;  %v238_v23 = vld [vmem:[%s835_s6 + $0x10] sm:$0xff]  ;;  %s447_s30 = sshll.u32 %s653_s12, 9 }
  0x59   : > { %v236_v15 = vld [vmem:[%s835_s6] sm:$0xff]  ;;  %v237_v16 = vld [vmem:[%s835_s6 + $0x8] sm:$0xff]  ;;  %s309_s19 = sshll.u32 %s232_s21, 4  ;;  %v239_v24 = vld [vmem:[%s835_s6 + $0x18] sm:$0xff]  ;;  %s859_s27 = scalar_lea.hbm %s908_s2, %s447_s30  ;;  %s854_s19 = int_to_ptr.vmem [resolvable:$true] %s309_s19 }
  0x5a   : > { %v243_v1 = vshrl.u32 %v242_v0, 7  ;;  %s291_s12 = scalar_lea.sflag [#allocation4], %s829_s15  ;;  %s575_s28 = scalar_lea.vmem %s854_s19, 512 }
  0x5b   : > { %p576_p0 = scmp.ne.s32.totalorder %s854_s19, %s575_s28  ;;  %p921_p5 = scmp.ne.s32.totalorder %s913_s22, 0 }
  0x5c   : > { %v244_v2 = vsub.s32 0, %v243_v1  ;;  %v248_v3 = vsub.s32 1, %v243_v1  ;;  %v252_v4 = vsub.s32 2, %v243_v1  ;;  %v256_v5 = vsub.s32 3, %v243_v1  ;;  %s665_s25 = smov [#allocation7]  }
  0x5d   : > { %v260_v6 = vsub.s32 4, %v243_v1  ;;  %v264_v7 = vsub.s32 5, %v243_v1  ;;  %v268_v8 = vsub.s32 6, %v243_v1  ;;  %v272_v9 = vsub.s32 7, %v243_v1  ;;  %p577_p7 = pnand %p576_p0, %p921_p5  ;;  %s579_s3 = sshll.u32 %s665_s25, 4  ;;  %s580_s3 = int_to_ptr.vmem [resolvable:$false] %s579_s3 }
  0x5e   : > { %v245_v11 = vrot.slane %v240_v10, %v244_v2  ;;  %v249_v12 = vrot.slane %v240_v10, %v248_v3  ;;  %v253_v13 = vrot.slane %v240_v10, %v252_v4  ;;  %v257_v14 = vrot.slane %v240_v10, %v256_v5  ;;  %s581_s7 = scalar_lea.vmem %s580_s3, 1024  ;;  %p582_p10 = scmp.lt.s32.totalorder %s854_s19, %s580_s3 }
  0x5f   : > { %v261_v17 = vrot.slane %v240_v10, %v260_v6  ;;  %v265_v18 = vrot.slane %v240_v10, %v264_v7  ;;  %v269_v19 = vrot.slane %v240_v10, %v268_v8  ;;  %v273_v20 = vrot.slane %v240_v10, %v272_v9  ;;  %p578_p4 = pneg %p577_p7  ;;  %p583_p12 = scmp.lt.s32.totalorder %s581_s7, %s575_s28 }
  0x60   : > { %v274_v21 = vcombine.low %v245_v11, %v249_v12  ;;  %v275_v22 = vcombine.low %v253_v13, %v257_v14 }
  0x61   : > { %v276_v25 = vcombine.low %v261_v17, %v265_v18  ;;  %v277_v26 = vcombine.low %v269_v19, %v273_v20  ;;  %p584_p1 = por %p583_p12, %p582_p10 }
  0x62   : > { %v282_v27 = vmul.f32 %v274_v21, %v236_v15  ;;  %v283_v28 = vmul.f32 %v275_v22, %v237_v16 }
  0x63   : > { %v284_v29 = vmul.f32 %v276_v25, %v238_v23  ;;  %v285_v30 = vmul.f32 %v277_v26, %v239_v24  ;;  %p585_p2 = pnand %p584_p1, %p578_p4 }
  0x64   : > { %286 = vst [vmem:[%s232_s21] sm:$0xff] %v282_v27  ;;  %287 = vst [vmem:[%s232_s21 + $0x8] sm:$0xff] %v283_v28 }
  0x65   : > { %288 = vst [vmem:[%s232_s21 + $0x10] sm:$0xff] %v284_v29  ;;  %289 = vst [vmem:[%s232_s21 + $0x18] sm:$0xff] %v285_v30 }
  0x66   : > { %588 = shalt.err (!%p585_p2)
}
  0x67   : > { %s589_s8 = scalar_lea.hbm %s859_s27, 512  ;;  %s593_s4 = scalar_lea.hbm %s908_s2, 1024 }
  0x68   : > { %p590_p9 = scmp.ne.s32.totalorder %s859_s27, %s589_s8  ;;  %p594_p6 = scmp.lt.u32.totalorder %s859_s27, %s908_s2 }
  0x69   : > { %p595_p13 = scmp.lt.u32.totalorder %s593_s4, %s589_s8  ;;  %p597_p0 = scmp.lt.u32.totalorder %s589_s8, %s859_s27 }
  0x6a   : > { %p591_p11 = pnand %p590_p9, %p921_p5 }
  0x6b   : > { %p596_p8 = por %p595_p13, %p594_p6 }
  0x6c   : > { %p592_p3 = pneg %p591_p11 }
  0x6d   : > { %p598_p7 = por %p597_p0, %p596_p8 }
  0x6f   : > { %p599_p4 = pnand %p598_p7, %p592_p3 }
  0x71   : > { %602 = shalt.err (!%p599_p4)
}
  0x72   : > { %452 = dma.vmem_to_hbm [thread:$0]  (%p921_p5), %s854_s19, 512, %s859_s27, %s291_s12  }
  0x73 PF: > { %s321_s29 = sand.u32 1, %s641_s9   ;;  %p922_p10 = scmp.ne.s32.totalorder %s914_s24, 0 }
  0x74   : > { %p923_p12 = scmp.ge.s32.totalorder %s661_s14, 2  ;;  %s322_s16 = scalar_lea.sflag [#allocation4], %s321_s29 }
  0x76   : > { %p462_p1 = pnand %p923_p12, %p922_p10 }
  0x78   : > { %636 = dma.done.wait (!%p462_p1), %s322_s16, 512  }
  0x79   : > { %638 = vsyncadd (!%p462_p1), %s322_s16, 4294966784  ;;  %s21_s14 = sadd.s32 1, %s661_s14   ;;  %s924_s9 = smov %s645_s10 }
  0x7a   : > { %p18_p2 = scmp.ge.s32.totalorder %s21_s14, 4   ;;  %s925_s10 = smov %s649_s11 }
  0x7b   : > { %s926_s11 = smov %s737_s23  ;;  %s927_s12 = smov %s657_s13 }
  0x7c   : > { %s928_s13 = smov %s930_s17  ;;  %20 = sbr.rel (!%p18_p2) target bundleno = 8 (0x8), region = 86 }
  0x83   :  { %327 = vsyncpa [#allocation3], 1 }
  0x84   :  { %329 = vsyncpa [#allocation3 + $0x1], 1 }
  0x85   :  { %330 = vsyncpa [#allocation6], 1 }
  0x86   :  { %332 = vsyncpa [#allocation6 + $0x1], 1 }
  0x87   :  { %333 = vsyncpa [#allocation4], 1 }
  0x88   :  { %335 = vsyncpa [#allocation4 + $0x1], 1 }

</bundles_post_ra>
